<compile_context>
chip_gen: v6e
topology: v6e:2x2x1
jax: 0.10.0
libtpu: 0.0.40
codegen_flags: <defaults>
</compile_context>

<pallas_src>
import functools
import math

import jax
import jax.numpy as jnp
from jax.experimental import pallas as pl
from jax.experimental.pallas import tpu as pltpu


def _mse_sum_kernel(a_ref, b_ref, o_ref, acc_ref, *,
                    rows, tile_rows, nblocks, steps_per_core):
    """Partial sum of (a - b)^2 over this core's row-blocks of the (rows, cols) view."""
    c = pl.program_id(0)   # core slot (size 1 unless num_cores > 1)
    i = pl.program_id(1)   # row-block step within this core

    @pl.when(i == 0)
    def _init():
        acc_ref[...] = jnp.zeros_like(acc_ref)

    d = a_ref[...].astype(jnp.float32) - b_ref[...].astype(jnp.float32)
    sq = d * d

    blk = c * steps_per_core + i  # logical (unclamped) block index

    # Steady state: unmasked accumulate.  Only the last logical block (and the
    # clamped out-of-range duplicates when num_cores > 1) can contain invalid
    # rows, so the iota/compare/select work is hoisted behind pl.when.
    @pl.when(blk < nblocks - 1)
    def _steady():
        acc_ref[...] += sq

    @pl.when(blk >= nblocks - 1)
    def _edge():
        # NOTE: must stay a select (jnp.where), not `sq * mask`: rows past
        # `rows` in a padded partial block hold undefined data (possibly
        # NaN/Inf), and clamped duplicate blocks re-read valid data that must
        # not be double counted.  int32 row ids are safe: rows <= n / cols.
        row0 = blk * tile_rows
        rid = row0 + jax.lax.broadcasted_iota(jnp.int32, sq.shape, 0)
        acc_ref[...] += jnp.where(rid < rows, sq, jnp.float32(0.0))

    @pl.when(i == pl.num_programs(1) - 1)
    def _fin():
        o_ref[0, 0] = jnp.sum(acc_ref[...])   # epilogue-only cross-lane reduce


def _choose_cols(n, lo=128, hi=8192):
    """Pick a divisor of n in [lo, hi] minimising lane-padding waste (then largest)."""
    best_key, best_c = None, None
    for c in range(lo, min(hi, n) + 1):
        if n % c:
            continue
        pad = (-c) % 128
        key = (pad / (c + pad), -c)
        if best_key is None or key < best_key:
            best_key, best_c = key, c
    return best_c


def projected_mean_squared_error(target: jax.Array, pred: jax.Array, *,
                                 cols: int | None = None,
                                 tile_rows: int | None = None,
                                 num_cores: int = 1,
                                 block_bytes: int = 2 << 20,
                                 min_kernel_elems: int = 8192) -> jax.Array:
    """MSE(target, pred) via a lane-dense, zero-copy Pallas TPU streaming reduction.

    num_cores: set to 2 on v7x (2 TensorCores/chip) to shard the leading grid
    axis with pltpu.CORE_PARALLEL; keep 1 on v5e/v6e (single TC).
    """
    assert target.shape == pred.shape, "shapes must match"
    n = math.prod(target.shape) if target.shape else 1
    if n == 0:
        return jnp.float32(jnp.nan)   # torch.mean of an empty tensor is NaN

    def _jnp_mse(a, b):
        return jnp.mean(jnp.square(a.astype(jnp.float32) - b.astype(jnp.float32)))

    # Tiny inputs: pallas_call launch + per-step overhead dominates; a fused
    # XLA reduction is faster.
    if n < min_kernel_elems:
        return _jnp_mse(target, pred)

    if cols is None:
        cols = _choose_cols(n)
    if cols is None or n % cols != 0:
        # No usable contiguous 2-D factorisation (e.g. n = 3 * large_prime).
        # TODO(synk): handle fully ragged n in-kernel (1-D blocks + element
        # mask) instead of falling back to an XLA fusion here.
        return _jnp_mse(target, pred)

    rows = n // cols
    # Contiguous reshape == bitcast: no HBM copy in front of the custom call.
    t2 = target.reshape(rows, cols)
    p2 = pred.reshape(rows, cols)

    cols_pad = -(-cols // 128) * 128
    row_bytes = cols_pad * 4
    if tile_rows is None:
        tile_rows = max(8, (block_bytes // row_bytes) // 8 * 8)
    if tile_rows >= rows:
        tile_rows = rows                     # single block; full-dim block is legal
    else:
        tile_rows = max(8, (tile_rows // 8) * 8)

    nblocks = -(-rows // tile_rows)
    num_cores = max(1, int(num_cores))
    steps_per_core = -(-nblocks // num_cores)

    kernel = functools.partial(_mse_sum_kernel, rows=rows, tile_rows=tile_rows,
                               nblocks=nblocks, steps_per_core=steps_per_core)

    def in_map(c, i):
        # Clamp so out-of-range steps (ragged core split) re-read a valid block;
        # the in-kernel edge mask zeroes their contribution.
        return (jnp.minimum(c * steps_per_core + i, nblocks - 1), 0)

    itemsize = jnp.dtype(target.dtype).itemsize
    sub_pad = -(-tile_rows // 8) * 8
    in_block_bytes = sub_pad * cols_pad * itemsize
    acc_bytes = sub_pad * cols_pad * 4
    footprint = 2 * 2 * in_block_bytes + acc_bytes   # 2 inputs, double-buffered, + acc
    cp_kwargs = {}
    if footprint > 12 * 1024 * 1024:
        cp_kwargs["vmem_limit_bytes"] = min(int(footprint * 3 // 2), 48 * 1024 * 1024)

    if num_cores > 1:
        # Only CORE_PARALLEL actually shards the axis across TensorCores (v7x).
        dim_sem = (pltpu.CORE_PARALLEL, pltpu.ARBITRARY)
    else:
        dim_sem = ("arbitrary", "arbitrary")

    partials = pl.pallas_call(
        kernel,
        out_shape=jax.ShapeDtypeStruct((num_cores, 1), jnp.float32),
        grid_spec=pltpu.PrefetchScalarGridSpec(
            num_scalar_prefetch=0,
            grid=(num_cores, steps_per_core),
            in_specs=[
                pl.BlockSpec((tile_rows, cols), in_map),
                pl.BlockSpec((tile_rows, cols), in_map),
            ],
            out_specs=pl.BlockSpec((1, 1), lambda c, i: (c, 0),
                                   memory_space=pltpu.SMEM),
            scratch_shapes=[pltpu.VMEM((tile_rows, cols), jnp.float32)],
        ),
        compiler_params=pltpu.CompilerParams(
            dimension_semantics=dim_sem, **cp_kwargs),
        cost_estimate=pl.CostEstimate(
            flops=3 * n, transcendentals=0,
            bytes_accessed=2 * n * itemsize + 4),
    )(t2, p2)

    return jnp.sum(partials) / jnp.float32(n)


if __name__ == "__main__":
    key = jax.random.PRNGKey(0)
    k1, k2 = jax.random.split(key)

    def _check(shape, **kw):
        a = jax.random.normal(k1, shape, dtype=jnp.float32)
        b = jax.random.normal(k2, shape, dtype=jnp.float32)
        out = jax.block_until_ready(projected_mean_squared_error(a, b, **kw))
        ref = jnp.mean(jnp.square(a - b))
        assert jnp.allclose(out, ref, rtol=1e-5, atol=1e-6), (shape, kw, out, ref)

    # batch=2, particles=683, xyz=3 -> 4098 elems: tiny-input fused-jnp path.
    _check((2, 683, 3))
    # batch=2, particles=2048, xyz=3 -> 12288 elems: kernel path, zero-copy
    # factorisation (cols divides n exactly, no masking needed).
    _check((2, 2048, 3))
    # Same tensor, forced cols/tile_rows so the last row-block is partial:
    # exercises the pl.when-gated edge mask in compiled mode.
    _check((2, 2048, 3), cols=512, tile_rows=16)
    # batch=4, particles=1025, xyz=3 -> 12300 elems: kernel path with a
    # non-128-multiple cols (full-dim last block dim).
    _check((4, 1025, 3))

    print("KERNEL_OK")
</pallas_src>

<mosaic_0001>
module attributes {stable_mosaic.version = 11 : i64} {
  func.func @_mse_sum_kernel(%arg0: i32, %arg1: i32, %arg2: memref<2x6144xf32, #tpu.memory_space<vmem>>, %arg3: memref<2x6144xf32, #tpu.memory_space<vmem>>, %arg4: memref<1x1xf32, #tpu.memory_space<smem>>, %arg5: memref<2x6144xf32, #tpu.memory_space<vmem>>) attributes {dimension_semantics = [#tpu.dimension_semantics<arbitrary>, #tpu.dimension_semantics<arbitrary>], iteration_bounds = array<i64: 1, 1>, scalar_prefetch = 0 : i64, scratch_operands = 1 : i64, tpu.core_type = #tpu.core_type<tc>, window_params = [{transform_indices = @transform_0, window_bounds = array<i64: 2, 6144>}, {transform_indices = @transform_1, window_bounds = array<i64: 2, 6144>}, {transform_indices = @transform_2, window_bounds = array<i64: 1, 1>}]} {
    %c0_i32 = arith.constant 0 : i32
    %0 = arith.cmpi eq, %arg1, %c0_i32 : i32
    %1 = arith.extui %0 : i1 to i32
    %c0_i32_0 = arith.constant 0 : i32
    %2 = arith.cmpi ne, %1, %c0_i32_0 : i32
    scf.if %2 {
      %cst = arith.constant 0.000000e+00 : f32
      %18 = vector.broadcast %cst : f32 to vector<2x6144xf32>
      %c0_10 = arith.constant 0 : index
      %c0_11 = arith.constant 0 : index
      %19 = vector.load %arg5[%c0_10, %c0_11] : memref<2x6144xf32, #tpu.memory_space<vmem>>, vector<2x6144xf32>
      tpu.vector_store %arg5[%c0_10, %c0_11], %18 {strides = array<i32>} : memref<2x6144xf32, #tpu.memory_space<vmem>>, vector<2x6144xf32>,
    } else {
    }
    %c0 = arith.constant 0 : index
    %c0_1 = arith.constant 0 : index
    %3 = vector.load %arg2[%c0, %c0_1] : memref<2x6144xf32, #tpu.memory_space<vmem>>, vector<2x6144xf32>
    %c0_2 = arith.constant 0 : index
    %c0_3 = arith.constant 0 : index
    %4 = vector.load %arg3[%c0_2, %c0_3] : memref<2x6144xf32, #tpu.memory_space<vmem>>, vector<2x6144xf32>
    %5 = arith.subf %3, %4 : vector<2x6144xf32>
    %6 = arith.mulf %5, %5 : vector<2x6144xf32>
    %c1_i32 = arith.constant 1 : i32
    %7 = arith.muli %arg0, %c1_i32 : i32
    %8 = arith.addi %7, %arg1 : i32
    %c0_i32_4 = arith.constant 0 : i32
    %9 = arith.cmpi slt, %8, %c0_i32_4 : i32
    %10 = arith.extui %9 : i1 to i32
    %c0_i32_5 = arith.constant 0 : i32
    %11 = arith.cmpi ne, %10, %c0_i32_5 : i32
    scf.if %11 {
      %c0_10 = arith.constant 0 : index
      %c0_11 = arith.constant 0 : index
      %18 = vector.load %arg5[%c0_10, %c0_11] : memref<2x6144xf32, #tpu.memory_space<vmem>>, vector<2x6144xf32>
      %19 = arith.addf %18, %6 : vector<2x6144xf32>
      %c0_12 = arith.constant 0 : index
      %c0_13 = arith.constant 0 : index
      %20 = vector.load %arg5[%c0_12, %c0_13] : memref<2x6144xf32, #tpu.memory_space<vmem>>, vector<2x6144xf32>
      tpu.vector_store %arg5[%c0_12, %c0_13], %19 {strides = array<i32>} : memref<2x6144xf32, #tpu.memory_space<vmem>>, vector<2x6144xf32>,
    } else {
    }
    %c0_i32_6 = arith.constant 0 : i32
    %12 = arith.cmpi sge, %8, %c0_i32_6 : i32
    %13 = arith.extui %12 : i1 to i32
    %c0_i32_7 = arith.constant 0 : i32
    %14 = arith.cmpi ne, %13, %c0_i32_7 : i32
    scf.if %14 {
      %c2_i32 = arith.constant 2 : i32
      %18 = arith.muli %8, %c2_i32 : i32
      %19 = tpu.iota {dimensions = array<i32: 0>} : vector<2x6144xi32>
      %20 = vector.broadcast %18 : i32 to vector<2x6144xi32>
      %21 = arith.addi %20, %19 : vector<2x6144xi32>
      %c0_10 = arith.constant 0 : index
      %c0_11 = arith.constant 0 : index
      %22 = vector.load %arg5[%c0_10, %c0_11] : memref<2x6144xf32, #tpu.memory_space<vmem>>, vector<2x6144xf32>
      %c2_i32_12 = arith.constant 2 : i32
      %23 = vector.broadcast %c2_i32_12 : i32 to vector<2x6144xi32>
      %24 = arith.cmpi slt, %21, %23 : vector<2x6144xi32>
      %cst = arith.constant 0.000000e+00 : f32
      %25 = vector.broadcast %cst : f32 to vector<2x6144xf32>
      %26 = arith.select %24, %6, %25 : vector<2x6144xi1>, vector<2x6144xf32>
      %27 = arith.addf %22, %26 : vector<2x6144xf32>
      %c0_13 = arith.constant 0 : index
      %c0_14 = arith.constant 0 : index
      %28 = vector.load %arg5[%c0_13, %c0_14] : memref<2x6144xf32, #tpu.memory_space<vmem>>, vector<2x6144xf32>
      tpu.vector_store %arg5[%c0_13, %c0_14], %27 {strides = array<i32>} : memref<2x6144xf32, #tpu.memory_space<vmem>>, vector<2x6144xf32>,
    } else {
    }
    %c0_i32_8 = arith.constant 0 : i32
    %15 = arith.cmpi eq, %arg1, %c0_i32_8 : i32
    %16 = arith.extui %15 : i1 to i32
    %c0_i32_9 = arith.constant 0 : i32
    %17 = arith.cmpi ne, %16, %c0_i32_9 : i32
    scf.if %17 {
      %c0_10 = arith.constant 0 : index
      %c0_11 = arith.constant 0 : index
      %18 = vector.load %arg5[%c0_10, %c0_11] : memref<2x6144xf32, #tpu.memory_space<vmem>>, vector<2x6144xf32>
      %19 = vector.shape_cast %18 : vector<2x6144xf32> to vector<1x2x6144xf32>
      %cst = arith.constant dense<0.000000e+00> : vector<1xf32>
      %20 = vector.multi_reduction <add>, %19, %cst [1, 2] : vector<1x2x6144xf32> to vector<1xf32>
      %21 = vector.shape_cast %20 : vector<1xf32> to vector<1x1x1xf32>
      %22 = vector.extract %21[0, 0, 0] : f32 from vector<1x1x1xf32>
      %c0_12 = arith.constant 0 : index
      %c0_13 = arith.constant 0 : index
      %23 = memref.load %arg4[%c0_12, %c0_13] : memref<1x1xf32, #tpu.memory_space<smem>>
      memref.store %22, %arg4[%c0_12, %c0_13] : memref<1x1xf32, #tpu.memory_space<smem>>
    } else {
    }
    return
  }
  func.func @transform_0(%arg0: i32, %arg1: i32) -> (i32, i32) {
    %c1_i32 = arith.constant 1 : i32
    %0 = arith.muli %arg0, %c1_i32 : i32
    %1 = arith.addi %0, %arg1 : i32
    %c0_i32 = arith.constant 0 : i32
    %2 = arith.minsi %1, %c0_i32 : i32
    %c0_i32_0 = arith.constant 0 : i32
    %c0_i32_1 = arith.constant 0 : i32
    return %2, %c0_i32_0 : i32, i32
  }
  func.func @transform_1(%arg0: i32, %arg1: i32) -> (i32, i32) {
    %c1_i32 = arith.constant 1 : i32
    %0 = arith.muli %arg0, %c1_i32 : i32
    %1 = arith.addi %0, %arg1 : i32
    %c0_i32 = arith.constant 0 : i32
    %2 = arith.minsi %1, %c0_i32 : i32
    %c0_i32_0 = arith.constant 0 : i32
    %c0_i32_1 = arith.constant 0 : i32
    return %2, %c0_i32_0 : i32, i32
  }
  func.func @transform_2(%arg0: i32, %arg1: i32) -> (i32, i32) {
    %c0_i32 = arith.constant 0 : i32
    %c0_i32_0 = arith.constant 0 : i32
    return %arg0, %c0_i32 : i32, i32
  }
}

</mosaic_0001>

<bundles_post_ra>
// kernel: tpu_custom_call.1
= control target key start
LH: loop header
LB: loop body
LE: loop exit
PB: predicated region body
PF: predicated region fallthrough
CT: control target
= control target key end

     0   :  { %7 = vsyncpa [#allocation4], 0  ;;  %s1618_s0 = inlined_call_operand.hbm [shape: f32[2,6144], index: 0, kind: input, shape index: {}]   ;;  %s1619_s1 = inlined_call_operand.hbm [shape: f32[2,6144], index: 1, kind: input, shape index: {}]   ;;  %s1620_s2 = inlined_call_operand.hbm [shape: f32[1,1], index: 2, kind: output, shape index: {}]  }
   0x1   :  { %8 = vsyncpa [#allocation7], 0 }
   0x2   :  { %9 = vsyncpa [#allocation5], 0  ;;  %s1258_s9 = smov [#allocation3]   ;;  %s1259_s11 = smov [#allocation6]  }
   0x3   :  { %s22_s10 = sshll.u32 %s1258_s9, 4  ;;  %s38_s12 = sshll.u32 %s1259_s11, 4  ;;  %s23_s10 = int_to_ptr.vmem [resolvable:$true] %s22_s10  ;;  %s39_s12 = int_to_ptr.vmem [resolvable:$true] %s38_s12 }
   0x4   :  { %s1212_s13 = scalar_lea.vmem %s23_s10, 1536  ;;  %p1217_p1 = scmp.lt.s32.totalorder %s23_s10, %s23_s10 }
   0x5   :  { %p1213_p0 = scmp.ne.s32.totalorder %s23_s10, %s1212_s13  ;;  %p1218_p2 = scmp.lt.s32.totalorder %s1212_s13, %s1212_s13 }
   0x7   :  { %p1219_p3 = por %p1218_p2, %p1217_p1 }
   0x9   :  { %p1220_p4 = pnand %p1219_p3, %p1213_p0 }
   0xb   :  { %1223 = shalt.err (!%p1220_p4)
}
   0xc   :  { %25 = dma.hbm_to_vmem [thread:$0]  %s1618_s0, 1536, %s23_s10, [#allocation4]  }
   0xd   :  { %s1232_s16 = scalar_lea.vmem %s39_s12, 1536  ;;  %p1237_p6 = scmp.lt.s32.totalorder %s39_s12, %s39_s12 }
   0xe   :  { %p1233_p5 = scmp.ne.s32.totalorder %s39_s12, %s1232_s16  ;;  %p1238_p7 = scmp.lt.s32.totalorder %s1232_s16, %s1232_s16 }
  0x10   :  { %p1239_p8 = por %p1238_p7, %p1237_p6 }
  0x12   :  { %p1240_p9 = pnand %p1239_p8, %p1233_p5 }
  0x14   :  { %1243 = shalt.err (!%p1240_p9)
}
  0x15   :  { %41 = dma.hbm_to_vmem [thread:$0]  %s1619_s1, 1536, %s39_s12, [#allocation7]  }
  0x16   :  { %1252 = dma.done.wait [#allocation4], 1536  }
  0x17   :  { %1253 = vsyncadd [#allocation4], 4294965760 }
  0x18   :  { %1254 = dma.done.wait [#allocation7], 1536  }
  0x19   :  { %1255 = vsyncadd [#allocation7], 4294965760  ;;  %v78_v0 = vld [vmem:[#allocation3 + $0x40] sm:$0xff]  ;;  %v79_v2 = vld [vmem:[#allocation3 + $0x48] sm:$0xff]  ;;  %v164_v10 = vlaneseq  ;;  %v1260_v11 = vmov 1983009808  }
  0x1a   :  { %v90_v1 = vld [vmem:[#allocation6 + $0x40] sm:$0xff]  ;;  %v91_v3 = vld [vmem:[#allocation6 + $0x48] sm:$0xff]  ;;  %v80_v4 = vld [vmem:[#allocation3 + $0x50] sm:$0xff]  ;;  %v195_v12 = vunpack.c.l.s4 %v1260_v11  ;;  %vm1060_vm1 = vcmask 1041408   ;;  %s1261_s1 = smov [#allocation8]  }
  0x1b   :  { %v92_v5 = vld [vmem:[#allocation6 + $0x50] sm:$0xff]  ;;  %v81_v6 = vld [vmem:[#allocation3 + $0x58] sm:$0xff]  ;;  %v102_v8 = vsub.f32 %v78_v0, %v90_v1  ;;  %v103_v9 = vsub.f32 %v79_v2, %v91_v3  ;;  %v70_v15 = vld [vmem:[#allocation3] sm:$0xff]  ;;  %v1283_v19 = vshrl.u32 %v164_v10, 7 }
  0x1c   :  { %v93_v7 = vld [vmem:[#allocation6 + $0x58] sm:$0xff]  ;;  %v104_v13 = vsub.f32 %v80_v4, %v92_v5  ;;  %v82_v16 = vld [vmem:[#allocation6] sm:$0xff]  ;;  %v196_v20 = vunpack.c.0.s8 %v195_v12  ;;  %v71_v25 = vld [vmem:[#allocation3 + $0x8] sm:$0xff] }
  0x1d   :  { %v105_v14 = vsub.f32 %v81_v6, %v93_v7  ;;  %v114_v17 = vmul.f32 %v102_v8, %v102_v8  ;;  %v115_v18 = vmul.f32 %v103_v9, %v103_v9  ;;  %v94_v22 = vsub.f32 %v70_v15, %v82_v16  ;;  %v72_v28 = vld [vmem:[#allocation3 + $0x10] sm:$0xff]  ;;  %v83_v29 = vld [vmem:[#allocation6 + $0x8] sm:$0xff]  ;;  %v73_v32 = vld [vmem:[#allocation3 + $0x18] sm:$0xff] }
  0x1e   :  { %v116_v21 = vmul.f32 %v104_v13, %v104_v13  ;;  %v1286_v26 = vsub.s32 %v196_v20, %v1283_v19  ;;  %v84_v30 = vld [vmem:[#allocation6 + $0x10] sm:$0xff]  ;;  %v85_v33 = vld [vmem:[#allocation6 + $0x18] sm:$0xff]  ;;  %v74_v39 = vld [vmem:[#allocation3 + $0x20] sm:$0xff]  ;;  %v95_v41 = vsub.f32 %v71_v25, %v83_v29  ;;  %vm180_vm0 = vcmp.lt.s32.totalorder %v1283_v19, 2 }
  0x1f   :  { %v117_v23 = vmul.f32 %v105_v14, %v105_v14  ;;  %v329_v24 = vcombine.high %v114_v17, %v114_v17  ;;  %v346_v27 = vcombine.high %v115_v18, %v115_v18  ;;  %v106_v34 = vmul.f32 %v94_v22, %v94_v22  ;;  %v86_v40 = vld [vmem:[#allocation6 + $0x20] sm:$0xff]  ;;  %v75_v62 = vld [vmem:[#allocation3 + $0x28] sm:$0xff]  ;;  %v76_v63 = vld [vmem:[#allocation3 + $0x30] sm:$0xff] }
  0x20   :  { %v363_v31 = vcombine.high %v116_v21, %v116_v21  ;;  %v336_v35 = vrot.slane %v114_v17, %v1286_v26  ;;  %v353_v38 = vrot.slane %v115_v18, %v1286_v26  ;;  %v96_v42 = vsub.f32 %v72_v28, %v84_v30  ;;  %v77_v4 = vld [vmem:[#allocation3 + $0x38] sm:$0xff]  ;;  %v87_v5 = vld [vmem:[#allocation6 + $0x28] sm:$0xff]  ;;  %v88_v10 = vld [vmem:[#allocation6 + $0x30] sm:$0xff] }
  0x21   :  { %v380_v36 = vcombine.high %v117_v23, %v117_v23  ;;  %v343_v37 = vrot.slane %v329_v24, %v1286_v26  ;;  %v360_v43 = vrot.slane %v346_v27, %v1286_v26  ;;  %v370_v44 = vrot.slane %v116_v21, %v1286_v26  ;;  %v89_v11 = vld [vmem:[#allocation6 + $0x38] sm:$0xff] }
  0x22   :  { %v97_v45 = vsub.f32 %v73_v32, %v85_v33  ;;  %v377_v46 = vrot.slane %v363_v31, %v1286_v26  ;;  %v387_v47 = vrot.slane %v117_v23, %v1286_v26  ;;  %v193_v48 = vcombine.high %v106_v34, %v106_v34 }
  0x23   :  { %v344_v49 = vcombine.high %v336_v35, %v336_v35  ;;  %v394_v50 = vrot.slane %v380_v36, %v1286_v26  ;;  %v98_v51 = vsub.f32 %v74_v39, %v86_v40  ;;  %v345_v52 = vcombine.high %v343_v37, %v343_v37 }
  0x24   :  { %v361_v53 = vcombine.high %v353_v38, %v353_v38  ;;  %v107_v54 = vmul.f32 %v95_v41, %v95_v41  ;;  %v108_v55 = vmul.f32 %v96_v42, %v96_v42  ;;  %v362_v56 = vcombine.high %v360_v43, %v360_v43 }
  0x25   :  { %v378_v57 = vcombine.high %v370_v44, %v370_v44  ;;  %v109_v58 = vmul.f32 %v97_v45, %v97_v45  ;;  %v200_v59 = vrot.slane %v106_v34, %v1286_v26  ;;  %v379_v60 = vcombine.high %v377_v46, %v377_v46 }
  0x26   :  { %v395_v61 = vcombine.high %v387_v47, %v387_v47  ;;  %v207_v0 = vrot.slane %v193_v48, %v1286_v26  ;;  %v396_v1 = vcombine.high %v394_v50, %v394_v50  ;;  %v477_v2 = vsel %vm180_vm0, %v336_v35, 0.0 }
  0x27   :  { %v478_v3 = vsel %vm180_vm0, %v344_v49, 0.0  ;;  %v479_v6 = vsel %vm180_vm0, %v343_v37, 0.0  ;;  %v480_v7 = vsel %vm180_vm0, %v345_v52, 0.0  ;;  %v481_v8 = vsel %vm180_vm0, %v353_v38, 0.0 }
  0x28   :  { %v482_v9 = vsel %vm180_vm0, %v361_v53, 0.0  ;;  %v483_v12 = vsel %vm180_vm0, %v360_v43, 0.0  ;;  %v484_v13 = vsel %vm180_vm0, %v362_v56, 0.0  ;;  %v485_v14 = vsel %vm180_vm0, %v370_v44, 0.0 }
  0x29   :  { %v486_v15 = vsel %vm180_vm0, %v378_v57, 0.0  ;;  %v487_v16 = vsel %vm180_vm0, %v377_v46, 0.0  ;;  %v488_v17 = vsel %vm180_vm0, %v379_v60, 0.0  ;;  %v489_v18 = vsel %vm180_vm0, %v387_v47, 0.0 }
  0x2a   :  { %v490_v20 = vsel %vm180_vm0, %v395_v61, 0.0  ;;  %v210_v21 = vcombine.high %v107_v54, %v107_v54  ;;  %v227_v22 = vcombine.high %v108_v55, %v108_v55  ;;  %v491_v23 = vsel %vm180_vm0, %v394_v50, 0.0 }
  0x2b   :  { %v492_v24 = vsel %vm180_vm0, %v396_v1, 0.0  ;;  %v99_v25 = vsub.f32 %v75_v62, %v87_v5  ;;  %v100_v27 = vsub.f32 %v76_v63, %v88_v10  ;;  %v101_v28 = vsub.f32 %v77_v4, %v89_v11 }
  0x2c   :  { %v217_v29 = vrot.slane %v107_v54, %v1286_v26  ;;  %v110_v30 = vmul.f32 %v98_v51, %v98_v51  ;;  %v234_v31 = vrot.slane %v108_v55, %v1286_v26  ;;  %v244_v32 = vcombine.high %v109_v58, %v109_v58 }
  0x2d   :  { %v1334_v33 = vrot.slane %v109_v58, %v1286_v26  ;;  %v208_v34 = vcombine.high %v200_v59, %v200_v59  ;;  %v209_v35 = vcombine.high %v207_v0, %v207_v0  ;;  %v224_v36 = vrot.slane %v210_v21, %v1286_v26 }
  0x2e   :  { %v241_v37 = vrot.slane %v227_v22, %v1286_v26  ;;  %v111_v38 = vmul.f32 %v99_v25, %v99_v25  ;;  %v1338_v39 = vmul.f32 %v100_v27, %v100_v27  ;;  %v1340_v40 = vmul.f32 %v101_v28, %v101_v28 }
  0x2f   :  { %v225_v41 = vcombine.high %v217_v29, %v217_v29  ;;  %v242_v42 = vcombine.high %v234_v31, %v234_v31  ;;  %v258_v43 = vrot.slane %v244_v32, %v1286_v26  ;;  %v259_v44 = vcombine.high %v1334_v33, %v1334_v33 }
  0x30   :  { %v261_v45 = vcombine.high %v110_v30, %v110_v30  ;;  %v445_v46 = vsel %vm180_vm0, %v200_v59, 0.0  ;;  %v446_v47 = vsel %vm180_vm0, %v208_v34, 0.0  ;;  %v447_v48 = vsel %vm180_vm0, %v207_v0, 0.0 }
  0x31   :  { %v448_v49 = vsel %vm180_vm0, %v209_v35, 0.0  ;;  %v226_v50 = vcombine.high %v224_v36, %v224_v36  ;;  %v243_v51 = vcombine.high %v241_v37, %v241_v37  ;;  %v268_v52 = vrot.slane %v110_v30, %v1286_v26 }
  0x32   :  { %v677_v53 = vcombine.low %v477_v2, %v478_v3  ;;  %v278_v54 = vcombine.high %v111_v38, %v111_v38  ;;  %v449_v55 = vsel %vm180_vm0, %v217_v29, 0.0  ;;  %v450_v56 = vsel %vm180_vm0, %v225_v41, 0.0 }
  0x33   :  { %v678_v57 = vcombine.low %v479_v6, %v480_v7  ;;  %v541_v58 = vcombine.low %v445_v46, %v446_v47  ;;  %v542_v59 = vcombine.low %v447_v48, %v448_v49  ;;  %v694_v61 = vcombine.low %v481_v8, %v482_v9 }
  0x34   :  { %v685_v60 = vrot.slane %v677_v53, %v1286_v26  ;;  %v451_v62 = vsel %vm180_vm0, %v224_v36, 0.0  ;;  %v695_v0 = vcombine.low %v483_v12, %v484_v13  ;;  %v711_v1 = vcombine.low %v485_v14, %v486_v15 }
  0x35   :  { %v692_v63 = vrot.slane %v678_v57, %v1286_v26  ;;  %v452_v2 = vsel %vm180_vm0, %v226_v50, 0.0  ;;  %v702_v3 = vrot.slane %v694_v61, %v1286_v26  ;;  %v712_v4 = vcombine.low %v487_v16, %v488_v17 }
  0x36   :  { %v728_v5 = vcombine.low %v489_v18, %v490_v20  ;;  %v709_v7 = vrot.slane %v695_v0, %v1286_v26  ;;  %v719_v10 = vrot.slane %v711_v1, %v1286_v26  ;;  %v729_v8 = vcombine.low %v491_v23, %v492_v24 }
  0x37   :  { %v693_v6 = vcombine.low %v685_v60, %v692_v63  ;;  %v549_v9 = vrot.slane %v541_v58, %v1286_v26  ;;  %v556_v11 = vrot.slane %v542_v59, %v1286_v26  ;;  %v726_v12 = vrot.slane %v712_v4, %v1286_v26 }
  0x38   :  { %v736_v13 = vrot.slane %v728_v5, %v1286_v26  ;;  %v260_v14 = vcombine.high %v258_v43, %v258_v43  ;;  %v275_v15 = vrot.slane %v261_v45, %v1286_v26  ;;  %v710_v21 = vcombine.low %v702_v3, %v709_v7 }
  0x39   :  { %v743_v16 = vrot.slane %v729_v8, %v1286_v26  ;;  %v1374_v17 = vrot.slane %v111_v38, %v1286_v26  ;;  %v558_v18 = vcombine.low %v449_v55, %v450_v56  ;;  %v559_v20 = vcombine.low %v451_v62, %v452_v2 }
  0x3a   :  { %v727_v22 = vcombine.low %v719_v10, %v726_v12  ;;  %v1377_v23 = vrot.slane %v278_v54, %v1286_v26  ;;  %v295_v24 = vcombine.high %v1338_v39, %v1338_v39  ;;  %v453_v25 = vsel %vm180_vm0, %v234_v31, 0.0 }
  0x3b   :  { %v744_v27 = vcombine.low %v736_v13, %v743_v16  ;;  %v454_v28 = vsel %vm180_vm0, %v242_v42, 0.0  ;;  %v455_v29 = vsel %vm180_vm0, %v241_v37, 0.0  ;;  %v456_v30 = vsel %vm180_vm0, %v243_v51, 0.0 }
  0x3c   :  { %v557_v32 = vcombine.low %v549_v9, %v556_v11  ;;  %v276_v34 = vcombine.high %v268_v52, %v268_v52  ;;  %v277_v35 = vcombine.high %v275_v15, %v275_v15  ;;  %v1391_v36 = vrot.slane %v1338_v39, %v1286_v26 }
  0x3d   :  { %v457_v31 = vsel %vm180_vm0, %v1334_v33, 0.0  ;;  %v458_v38 = vsel %vm180_vm0, %v259_v44, 0.0  ;;  %v566_v37 = vrot.slane %v558_v18, %v1286_v26  ;;  %v573_v41 = vrot.slane %v559_v20, %v1286_v26 }
  0x3e   :  { %v1186_v42 = vcombine.low %v556_v11, %v556_v11  ;;  %v459_v45 = vsel %vm180_vm0, %v258_v43, 0.0  ;;  %v460_v46 = vsel %vm180_vm0, %v260_v14, 0.0  ;;  %v575_v39 = vcombine.low %v453_v25, %v454_v28 }
  0x3f   :  { %v576_v47 = vcombine.low %v455_v29, %v456_v30  ;;  %v293_v48 = vcombine.high %v1374_v17, %v1374_v17  ;;  %v294_v33 = vcombine.high %v1377_v23, %v1377_v23  ;;  %v461_v44 = vsel %vm180_vm0, %v268_v52, 0.0 }
  0x40   :  { %v815_v49 = vrot.slane %v557_v32, %v1286_v26  ;;  %v462_v50 = vsel %vm180_vm0, %v276_v34, 0.0  ;;  %v463_v43 = vsel %vm180_vm0, %v275_v15, 0.0  ;;  %v464_v51 = vsel %vm180_vm0, %v277_v35, 0.0 }
  0x41   :  { %v592_v53 = vcombine.low %v457_v31, %v458_v38  ;;  %v574_v54 = vcombine.low %v566_v37, %v573_v41  ;;  %v593_v55 = vcombine.low %v459_v45, %v460_v46  ;;  %v822_v56 = vrot.slane %v1186_v42, %v1286_v26 }
  0x42   :  { %v1194_v57 = vcombine.low %v692_v63, %v692_v63  ;;  %v583_v58 = vrot.slane %v575_v39, %v1286_v26  ;;  %v590_v52 = vrot.slane %v576_v47, %v1286_v26  ;;  %v1421_v59 = vrot.slane %v693_v6, %v1286_v26 }
  0x43   :  { %v1195_v60 = vcombine.low %v709_v7, %v709_v7  ;;  %v823_v61 = vcombine.high %v815_v49, %v815_v49  ;;  %v968_v0 = vrot.slane %v710_v21, %v1286_v26  ;;  %v1196_v1 = vcombine.low %v726_v12, %v726_v12 }
  0x44   :  { %v958_v62 = vrot.slane %v1194_v57, %v1286_v26  ;;  %v1187_v2 = vcombine.low %v573_v41, %v573_v41  ;;  %v985_v4 = vrot.slane %v727_v22, %v1286_v26  ;;  %v1197_v63 = vcombine.low %v743_v16, %v743_v16 }
  0x45   :  { %v975_v3 = vrot.slane %v1195_v60, %v1286_v26  ;;  %v824_v5 = vcombine.high %v822_v56, %v822_v56  ;;  %v832_v10 = vrot.slane %v574_v54, %v1286_v26  ;;  %v992_v8 = vrot.slane %v1196_v1, %v1286_v26 }
  0x46   :  { %v1002_v6 = vrot.slane %v744_v27, %v1286_v26  ;;  %v591_v7 = vcombine.low %v583_v58, %v590_v52  ;;  %v600_v9 = vrot.slane %v592_v53, %v1286_v26  ;;  %v1009_v11 = vrot.slane %v1197_v63, %v1286_v26 }
  0x47   :  { %v1061_v12 = vsel %vm1060_vm1, %v815_v49, 0.0  ;;  %v1434_v13 = vrot.slane %v593_v55, %v1286_v26  ;;  %v609_v14 = vcombine.low %v461_v44, %v462_v50  ;;  %v1062_v15 = vsel %vm1060_vm1, %v823_v61, 0.0 }
  0x48   :  { %v1064_v21 = vsel %vm1060_vm1, %v822_v56, 0.0  ;;  %v610_v16 = vcombine.low %v463_v43, %v464_v51  ;;  %v839_v18 = vrot.slane %v1187_v2, %v1286_v26  ;;  %v1188_v20 = vcombine.low %v590_v52, %v590_v52 }
  0x49   :  { %v1063_v22 = vadd.f32 %v1062_v15, %v1061_v12  ;;  %v1440_v25 = vrot.slane %v295_v24, %v1286_v26  ;;  %v1445_v27 = vsel %vm180_vm0, %v1374_v17, 0.0  ;;  %v840_v28 = vcombine.high %v832_v10, %v832_v10 }
  0x4a   :  { %v1066_v29 = vsel %vm1060_vm1, %v824_v5, 0.0  ;;  %v1450_v30 = vsel %vm180_vm0, %v293_v48, 0.0  ;;  %v1455_v32 = vsel %vm180_vm0, %v1377_v23, 0.0  ;;  %v849_v24 = vrot.slane %v591_v7, %v1286_v26 }
  0x4b   :  { %v1065_v34 = vadd.f32 %v1064_v21, %v1063_v22  ;;  %v1460_v35 = vsel %vm180_vm0, %v294_v33, 0.0  ;;  %v608_v17 = vcombine.low %v600_v9, %v1434_v13  ;;  %v1464_v31 = vrot.slane %v609_v14, %v1286_v26 }
  0x4c   :  { %v1068_v38 = vsel %vm1060_vm1, %v832_v10, 0.0  ;;  %v1468_v37 = vrot.slane %v610_v16, %v1286_v26  ;;  %v841_v41 = vcombine.high %v839_v18, %v839_v18  ;;  %v856_v23 = vrot.slane %v1188_v20, %v1286_v26 }
  0x4d   :  { %v1067_v42 = vadd.f32 %v1066_v29, %v1065_v34  ;;  %v1189_v45 = vcombine.low %v1434_v13, %v1434_v13  ;;  %v959_v46 = vcombine.high %v1421_v59, %v1421_v59  ;;  %v960_v39 = vcombine.high %v958_v62, %v958_v62 }
  0x4e   :  { %v1070_v47 = vsel %vm1060_vm1, %v840_v28, 0.0  ;;  %v857_v48 = vcombine.high %v849_v24, %v849_v24  ;;  %v976_v33 = vcombine.high %v968_v0, %v968_v0  ;;  %v977_v44 = vcombine.high %v975_v3, %v975_v3 }
  0x4f   :  { %v1069_v49 = vadd.f32 %v1068_v38, %v1067_v42  ;;  %v993_v50 = vcombine.high %v985_v4, %v985_v4  ;;  %v994_v43 = vcombine.high %v992_v8, %v992_v8  ;;  %v1010_v51 = vcombine.high %v1002_v6, %v1002_v6 }
  0x50   :  { %v1072_v53 = vsel %vm1060_vm1, %v839_v18, 0.0  ;;  %v1011_v54 = vcombine.high %v1009_v11, %v1009_v11  ;;  %v1074_v56 = vsel %vm1060_vm1, %v841_v41, 0.0  ;;  %v1076_v57 = vsel %vm1060_vm1, %v849_v24, 0.0 }
  0x51   :  { %v1071_v55 = vadd.f32 %v1070_v47, %v1069_v49  ;;  %v1480_v58 = vsel %vm1060_vm1, %v959_v46, 0.0  ;;  %v1483_v52 = vsel %vm1060_vm1, %v958_v62, 0.0  ;;  %v1486_v60 = vsel %vm1060_vm1, %v960_v39, 0.0 }
  0x52   :  { %v1489_v61 = vsel %vm1060_vm1, %v968_v0, 0.0  ;;  %v1492_v2 = vsel %vm1060_vm1, %v976_v33, 0.0  ;;  %v1495_v63 = vsel %vm1060_vm1, %v975_v3, 0.0  ;;  %v1498_v5 = vsel %vm1060_vm1, %v977_v44, 0.0 }
  0x53   :  { %v1073_v1 = vadd.f32 %v1072_v53, %v1071_v55  ;;  %v1501_v10 = vsel %vm1060_vm1, %v985_v4, 0.0  ;;  %v1504_v62 = vsel %vm1060_vm1, %v993_v50, 0.0  ;;  %v1507_v7 = vsel %vm1060_vm1, %v992_v8, 0.0 }
  0x54   :  { %v1510_v0 = vsel %vm1060_vm1, %v994_v43, 0.0  ;;  %v1513_v12 = vsel %vm1060_vm1, %v1002_v6, 0.0  ;;  %v1516_v3 = vsel %vm1060_vm1, %v1010_v51, 0.0  ;;  %v1519_v13 = vsel %vm1060_vm1, %v1009_v11, 0.0 }
  0x55   :  { %v1075_v9 = vadd.f32 %v1074_v56, %v1073_v1  ;;  %v858_v4 = vcombine.high %v856_v23, %v856_v23  ;;  %v866_v14 = vrot.slane %v608_v17, %v1286_v26  ;;  %v1078_v15 = vsel %vm1060_vm1, %v857_v48, 0.0 }
  0x56   :  { %v1524_v8 = vsel %vm1060_vm1, %v1011_v54, 0.0  ;;  %v312_v21 = vcombine.high %v1340_v40, %v1340_v40  ;;  %v310_v6 = vcombine.high %v1391_v36, %v1391_v36  ;;  %v1080_v18 = vsel %vm1060_vm1, %v856_v23, 0.0 }
  0x57   :  { %v1077_v16 = vadd.f32 %v1076_v57, %v1075_v9  ;;  %v311_v11 = vcombine.high %v1440_v25, %v1440_v25  ;;  %v626_v20 = vcombine.low %v1445_v27, %v1450_v30  ;;  %v627_v22 = vcombine.low %v1455_v32, %v1460_v35 }
  0x58   :  { %v625_v29 = vcombine.low %v1464_v31, %v1468_v37  ;;  %v873_v24 = vrot.slane %v1189_v45, %v1286_v26  ;;  %v874_v34 = vcombine.high %v866_v14, %v866_v14  ;;  %v1082_v17 = vsel %vm1060_vm1, %v858_v4, 0.0 }
  0x59   :  { %v1079_v28 = vadd.f32 %v1078_v15, %v1077_v16  ;;  %v319_v38 = vrot.slane %v1340_v40, %v1286_v26  ;;  %v326_v41 = vrot.slane %v312_v21, %v1286_v26  ;;  %v469_v27 = vsel %vm180_vm0, %v1391_v36, 0.0 }
  0x5a   :  { %v470_v30 = vsel %vm180_vm0, %v310_v6, 0.0  ;;  %v471_v32 = vsel %vm180_vm0, %v1440_v25, 0.0  ;;  %v1084_v35 = vsel %vm1060_vm1, %v866_v14, 0.0  ;;  %v472_v31 = vsel %vm180_vm0, %v311_v11, 0.0 }
  0x5b   :  { %v1081_v23 = vadd.f32 %v1080_v18, %v1079_v28  ;;  %v634_v40 = vrot.slane %v626_v20, %v1286_v26  ;;  %v641_v42 = vrot.slane %v627_v22, %v1286_v26  ;;  %v875_v46 = vcombine.high %v873_v24, %v873_v24 }
  0x5c   :  { %v1190_v36 = vcombine.low %v1468_v37, %v1468_v37  ;;  %v883_v39 = vrot.slane %v625_v29, %v1286_v26  ;;  %v1086_v47 = vsel %vm1060_vm1, %v874_v34, 0.0  ;;  %v327_v25 = vcombine.high %v319_v38, %v319_v38 }
  0x5d   :  { %v1083_v45 = vadd.f32 %v1082_v17, %v1081_v23  ;;  %v1088_v33 = vsel %vm1060_vm1, %v873_v24, 0.0  ;;  %v328_v44 = vcombine.high %v326_v41, %v326_v41  ;;  %v643_v49 = vcombine.low %v469_v27, %v470_v30 }
  0x5e   :  { %v644_v50 = vcombine.low %v471_v32, %v472_v31  ;;  %v642_v51 = vcombine.low %v634_v40, %v641_v42  ;;  %v890_v53 = vrot.slane %v1190_v36, %v1286_v26  ;;  %v891_v54 = vcombine.high %v883_v39, %v883_v39 }
  0x5f   :  { %v1085_v48 = vadd.f32 %v1084_v35, %v1083_v45  ;;  %v1090_v55 = vsel %vm1060_vm1, %v875_v46, 0.0  ;;  %v473_v37 = vsel %vm180_vm0, %v319_v38, 0.0  ;;  %v474_v57 = vsel %vm180_vm0, %v327_v25, 0.0 }
  0x60   :  { %v475_v1 = vsel %vm180_vm0, %v326_v41, 0.0  ;;  %v1092_v9 = vsel %vm1060_vm1, %v883_v39, 0.0  ;;  %v476_v4 = vsel %vm180_vm0, %v328_v44, 0.0  ;;  %v651_v14 = vrot.slane %v643_v49, %v1286_v26 }
  0x61   :  { %v1087_v43 = vadd.f32 %v1086_v47, %v1085_v48  ;;  %v658_v15 = vrot.slane %v644_v50, %v1286_v26  ;;  %v892_v16 = vcombine.high %v890_v53, %v890_v53  ;;  %v1191_v6 = vcombine.low %v641_v42, %v641_v42 }
  0x62   :  { %v900_v18 = vrot.slane %v642_v51, %v1286_v26  ;;  %v1094_v11 = vsel %vm1060_vm1, %v891_v54, 0.0  ;;  %v1096_v22 = vsel %vm1060_vm1, %v890_v53, 0.0  ;;  %v660_v28 = vcombine.low %v473_v37, %v474_v57 }
  0x63   :  { %v1089_v56 = vadd.f32 %v1088_v33, %v1087_v43  ;;  %v661_v29 = vcombine.low %v475_v1, %v476_v4  ;;  %v659_v34 = vcombine.low %v651_v14, %v658_v15  ;;  %v907_v19 = vrot.slane %v1191_v6, %v1286_v26 }
  0x64   :  { %v908_v17 = vcombine.high %v900_v18, %v900_v18  ;;  %v1098_v38 = vsel %vm1060_vm1, %v892_v16, 0.0  ;;  %v1100_v23 = vsel %vm1060_vm1, %v900_v18, 0.0  ;;  %v668_v27 = vrot.slane %v660_v28, %v1286_v26 }
  0x65   :  { %v1091_v21 = vadd.f32 %v1090_v55, %v1089_v56  ;;  %v675_v30 = vrot.slane %v661_v29, %v1286_v26  ;;  %v909_v35 = vcombine.high %v907_v19, %v907_v19  ;;  %v1192_v31 = vcombine.low %v658_v15, %v658_v15 }
  0x66   :  { %v917_v40 = vrot.slane %v659_v34, %v1286_v26  ;;  %v1102_v42 = vsel %vm1060_vm1, %v908_v17, 0.0  ;;  %v1104_v46 = vsel %vm1060_vm1, %v907_v19, 0.0 }
  0x67   :  { %v1093_v20 = vadd.f32 %v1092_v9, %v1091_v21  ;;  %v676_v39 = vcombine.low %v668_v27, %v675_v30  ;;  %v924_v47 = vrot.slane %v1192_v31, %v1286_v26  ;;  %v1106_v25 = vsel %vm1060_vm1, %v909_v35, 0.0 }
  0x68   :  { %v925_v48 = vcombine.high %v917_v40, %v917_v40  ;;  %v1108_v44 = vsel %vm1060_vm1, %v917_v40, 0.0  ;;  %v1193_v43 = vcombine.low %v675_v30, %v675_v30 }
  0x69   :  { %v1095_v24 = vadd.f32 %v1094_v11, %v1093_v20  ;;  %v926_v50 = vcombine.high %v924_v47, %v924_v47  ;;  %v934_v51 = vrot.slane %v676_v39, %v1286_v26  ;;  %v1112_v55 = vsel %vm1060_vm1, %v924_v47, 0.0 }
  0x6a   :  { %v1110_v53 = vsel %vm1060_vm1, %v925_v48, 0.0  ;;  %v941_v37 = vrot.slane %v1193_v43, %v1286_v26  ;;  %v1124_v26 = vsel %vm1060_vm1, %v1421_v59, 0.0 }
  0x6b   :  { %v1097_v41 = vadd.f32 %v1096_v22, %v1095_v24  ;;  %v942_v57 = vcombine.high %v934_v51, %v934_v51  ;;  %v1114_v1 = vsel %vm1060_vm1, %v926_v50, 0.0  ;;  %v1116_v4 = vsel %vm1060_vm1, %v934_v51, 0.0 }
  0x6c   :  { %v943_v15 = vcombine.high %v941_v37, %v941_v37  ;;  %v1120_v6 = vsel %vm1060_vm1, %v941_v37, 0.0 }
  0x6d   :  { %v1099_v32 = vadd.f32 %v1098_v38, %v1097_v41  ;;  %v1118_v21 = vsel %vm1060_vm1, %v942_v57, 0.0 }
  0x6e   :  { %v1122_v11 = vsel %vm1060_vm1, %v943_v15, 0.0 }
  0x6f   :  { %v1101_v45 = vadd.f32 %v1100_v23, %v1099_v32 }
  0x71   :  { %v1103_v36 = vadd.f32 %v1102_v42, %v1101_v45 }
  0x73   :  { %v1105_v33 = vadd.f32 %v1104_v46, %v1103_v36 }
  0x75   :  { %v1107_v49 = vadd.f32 %v1106_v25, %v1105_v33 }
  0x77   :  { %v1109_v54 = vadd.f32 %v1108_v44, %v1107_v49 }
  0x79   :  { %v1111_v56 = vadd.f32 %v1110_v53, %v1109_v54 }
  0x7b   :  { %v1113_v9 = vadd.f32 %v1112_v55, %v1111_v56 }
  0x7d   :  { %v1115_v14 = vadd.f32 %v1114_v1, %v1113_v9 }
  0x7f   :  { %v1117_v16 = vadd.f32 %v1116_v4, %v1115_v14 }
  0x81   :  { %v1119_v18 = vadd.f32 %v1118_v21, %v1117_v16 }
  0x83   :  { %v1121_v20 = vadd.f32 %v1120_v6, %v1119_v18 }
  0x85   :  { %v1123_v22 = vadd.f32 %v1122_v11, %v1121_v20 }
  0x87   :  { %v1125_v28 = vadd.f32 %v1124_v26, %v1123_v22 }
  0x89   :  { %v1127_v29 = vadd.f32 %v1480_v58, %v1125_v28 }
  0x8b   :  { %v1129_v24 = vadd.f32 %v1483_v52, %v1127_v29 }
  0x8d   :  { %v1131_v34 = vadd.f32 %v1486_v60, %v1129_v24 }
  0x8f   :  { %v1133_v19 = vadd.f32 %v1489_v61, %v1131_v34 }
  0x91   :  { %v1135_v17 = vadd.f32 %v1492_v2, %v1133_v19 }
  0x93   :  { %v1137_v38 = vadd.f32 %v1495_v63, %v1135_v17 }
  0x95   :  { %v1139_v41 = vadd.f32 %v1498_v5, %v1137_v38 }
  0x97   :  { %v1141_v23 = vadd.f32 %v1501_v10, %v1139_v41 }
  0x99   :  { %v1143_v59 = vadd.f32 %v1504_v62, %v1141_v23 }
  0x9b   :  { %v1145_v27 = vadd.f32 %v1507_v7, %v1143_v59 }
  0x9d   :  { %v1147_v58 = vadd.f32 %v1510_v0, %v1145_v27 }
  0x9f   :  { %v1149_v52 = vadd.f32 %v1513_v12, %v1147_v58 }
  0xa1   :  { %v1151_v60 = vadd.f32 %v1516_v3, %v1149_v52 }
  0xa3   :  { %v1153_v61 = vadd.f32 %v1519_v13, %v1151_v60 }
  0xa5   :  { %v1155_v2 = vadd.f32 %v1524_v8, %v1153_v61 }
  0xa7   :  { %1156 = vadd.xlane.f32.xlu0 %v1155_v2 }
 0x130   :  { %v1157_v63 = vpop.xlane.xlu0 %1156 }
 0x131   :  { %v1158_v30 = vrot.slane %v1157_v63, 4 }
 0x133   :  { %v1159_v5 = vadd.f32 %v1158_v30, %v1157_v63 }
 0x135   :  { %v1160_v32 = vrot.slane %v1159_v5, 2 }
 0x137   :  { %v1161_v10 = vadd.f32 %v1160_v32, %v1159_v5 }
 0x139   :  { %v1162_v35 = vrot.slane %v1161_v10, 1 }
 0x13b   :  { %v1163_v62 = vadd.f32 %v1162_v35, %v1161_v10 }
 0x13d   :  { %1198 = vpush %v1163_v62 }
 0x16e   :  { %s1199_s0 = spop %1198 }
 0x16f   :  { %1166 = sst [smem:[#allocation8]] %s1199_s0 }
 0x170   :  { %1174 = dma.smem_to_hbm %s1261_s1, 16, %s1620_s2, [#allocation5]  }
 0x171   :  { %1256 = dma.done.wait [#allocation5], 16  }
 0x172   :  { %1257 = vsyncadd [#allocation5], 4294967280 }
 0x173   :  { %1178 = sfence }
 0x174   :  { %1179 = vsyncpa [#allocation4], 1 }
 0x175   :  { %1180 = vsyncpa [#allocation7], 1 }
 0x176   :  { %1181 = vsyncpa [#allocation5], 1 }

</bundles_post_ra>
